<compile_context>
chip_gen: v7x
topology: tpu7x:2x2x1
jax: 0.10.0
libtpu: 0.0.40
codegen_flags: <defaults>
</compile_context>

<pallas_src>
import functools

import jax
import jax.numpy as jnp
from jax.experimental import pallas as pl
from jax.experimental.pallas import tpu as pltpu

LANE = 128          # padded feature width for the hidden layers
BM_LARGE = 2048     # batch tile (lane axis) for large batches


def mlp_kernel(x_ref, vecs_ref, w23_ref, o_ref):
    # x_ref:    (1, BM)   f32   -- batch on the lane axis
    # vecs_ref: (128, 8)  f32   -- packed column vectors (w1, b1, b2, b3, w4, b4)
    # w23_ref:  (2,128,128) bf16 -- padded W2^T and W3^T, (out, in) layout
    # o_ref:    (1, BM)   f32
    x = x_ref[...]                        # (1, BM)
    vecs = vecs_ref[...]                  # (128, 8)

    w1 = vecs[:, 0:1]                     # (128, 1) fc1 weight column (16 valid)
    b1 = vecs[:, 1:2]                     # (128, 1)
    b2 = vecs[:, 2:3]                     # (128, 1)
    b3 = vecs[:, 3:4]                     # (128, 1)
    w4 = vecs[:8, 4:5]                    # (8, 1)   fc4 weight column (8 valid)
    b4 = vecs[0:1, 5:6]                   # (1, 1)   fc4 bias

    # fc1 (1 -> 16): broadcast outer product on the VPU. (128,1)*(1,BM) -> (128,BM)
    h = jnp.maximum(w1 * x + b1, 0.0)
    # dropout1: identity in eval mode.

    # fc2 (16 -> 64): MXU matmul, bf16 operands, f32 accumulation.
    h = jnp.maximum(
        jnp.dot(w23_ref[0], h.astype(jnp.bfloat16),
                preferred_element_type=jnp.float32) + b2, 0.0)
    # dropout2: identity in eval mode.

    # fc3 (64 -> 8): MXU matmul, bf16 operands, f32 accumulation.
    h = jnp.maximum(
        jnp.dot(w23_ref[1], h.astype(jnp.bfloat16),
                preferred_element_type=jnp.float32) + b3, 0.0)
    # dropout3: identity in eval mode.

    # fc4 (8 -> 1): sublane reduce over the 8 valid feature rows (XLU) -> (1, BM).
    o_ref[...] = jnp.sum(h[:8, :] * w4, axis=0, keepdims=True) + b4


def prepare_params(params):
    """Pad & pack the weights once (outside the jitted forward).

    Returns:
      vecs: (128, 8) f32  -- columns: [w1, b1, b2, b3, w4, b4, 0, 0]
      w23:  (2, 128, 128) bf16 -- padded W2^T (64x16) and W3^T (8x64), (out, in)
    """
    vecs = jnp.zeros((LANE, 8), jnp.float32)
    vecs = vecs.at[:16, 0].set(params["w1"][0, :])   # w1: (1, 16)
    vecs = vecs.at[:16, 1].set(params["b1"])
    vecs = vecs.at[:64, 2].set(params["b2"])
    vecs = vecs.at[:8, 3].set(params["b3"])
    vecs = vecs.at[:8, 4].set(params["w4"][:, 0])    # w4: (8, 1)
    vecs = vecs.at[0, 5].set(params["b4"][0])

    w23 = jnp.zeros((2, LANE, LANE), jnp.float32)
    w23 = w23.at[0, :64, :16].set(params["w2"].T)    # w2: (16, 64) -> (64, 16)
    w23 = w23.at[1, :8, :64].set(params["w3"].T)     # w3: (64, 8)  -> (8, 64)
    return vecs, w23.astype(jnp.bfloat16)


def _choose_bm(batch):
    if batch <= BM_LARGE:
        return batch        # single full-array block: no padding, no wasted lanes
    return BM_LARGE         # multiple of 128 -> lane-aligned blocks


@jax.jit
def model_quad_2_forward(x, vecs, w23):
    """x: (B, 1) float32. Packed params from prepare_params()."""
    B = x.shape[0]
    BM = _choose_bm(B)
    Bp = ((B + BM - 1) // BM) * BM

    xr = x.astype(jnp.float32).reshape(1, B)          # free bitcast-reshape
    if Bp != B:
        xr = jnp.pad(xr, ((0, 0), (0, Bp - B)))       # only for ragged large batches

    out = pl.pallas_call(
        mlp_kernel,
        out_shape=jax.ShapeDtypeStruct((1, Bp), jnp.float32),
        grid_spec=pltpu.PrefetchScalarGridSpec(
            num_scalar_prefetch=0,
            grid=(Bp // BM,),
            in_specs=[
                pl.BlockSpec((1, BM), lambda i: (0, i)),            # x (lane-dense)
                pl.BlockSpec((LANE, 8), lambda i: (0, 0)),          # packed vectors
                pl.BlockSpec((2, LANE, LANE), lambda i: (0, 0, 0)), # fc2/fc3 weights
            ],
            out_specs=pl.BlockSpec((1, BM), lambda i: (0, i)),      # out (lane-dense)
        ),
        compiler_params=pltpu.CompilerParams(
            dimension_semantics=("parallel",)),
    )(xr, vecs, w23)

    if Bp != B:
        out = out[:, :B]
    return out.reshape(B, 1)


def init_params(key):
    """Deterministic init mirroring nn.Linear: U(-1/sqrt(fan_in), 1/sqrt(fan_in))."""
    dims = [1, 16, 64, 8, 1]
    params = {}
    for i in range(4):
        fan_in, fan_out = dims[i], dims[i + 1]
        key, kw, kb = jax.random.split(key, 3)
        bound = 1.0 / (fan_in ** 0.5)
        params[f"w{i+1}"] = jax.random.uniform(
            kw, (fan_in, fan_out), jnp.float32, -bound, bound)
        params[f"b{i+1}"] = jax.random.uniform(
            kb, (fan_out,), jnp.float32, -bound, bound)
    return params


def reference_forward(x, params):
    h = x
    for i in (1, 2, 3):
        h = jnp.maximum(h @ params[f"w{i}"] + params[f"b{i}"], 0.0)
    return h @ params["w4"] + params["b4"]


if __name__ == "__main__":
    key = jax.random.PRNGKey(0)
    kx, kp = jax.random.split(key)
    params = init_params(kp)
    vecs, w23 = prepare_params(params)   # packed/padded once, outside jit

    B = 64
    x = jax.random.normal(kx, (B, 1), jnp.float32)

    out = model_quad_2_forward(x, vecs, w23)
    jax.block_until_ready(out)

    ref = reference_forward(x, params)
    assert out.shape == (B, 1), out.shape
    # bf16 MXU matmuls -> loosened tolerance vs. the pure-f32 reference.
    assert jnp.allclose(out, ref, atol=5e-2, rtol=5e-2), (
        float(jnp.max(jnp.abs(out - ref))))

    print("KERNEL_OK")
</pallas_src>

<mosaic_0001>
module attributes {stable_mosaic.version = 11 : i64} {
  func.func @mlp_kernel(%arg0: i32, %arg1: memref<1x64xf32, #tpu.memory_space<vmem>>, %arg2: memref<128x8xf32, #tpu.memory_space<vmem>>, %arg3: memref<2x128x128xbf16, #tpu.memory_space<vmem>>, %arg4: memref<1x64xf32, #tpu.memory_space<vmem>>) attributes {dimension_semantics = [#tpu.dimension_semantics<parallel>], iteration_bounds = array<i64: 1>, scalar_prefetch = 0 : i64, scratch_operands = 0 : i64, tpu.core_type = #tpu.core_type<tc>, window_params = [{transform_indices = @transform_0, window_bounds = array<i64: 1, 64>}, {pipeline_mode = #tpu.pipeline_mode<synchronous>, transform_indices = @transform_1, window_bounds = array<i64: 128, 8>}, {pipeline_mode = #tpu.pipeline_mode<synchronous>, transform_indices = @transform_2, window_bounds = array<i64: 2, 128, 128>}, {transform_indices = @transform_3, window_bounds = array<i64: 1, 64>}]} {
    %c0 = arith.constant 0 : index
    %c0_0 = arith.constant 0 : index
    %0 = vector.load %arg1[%c0, %c0_0] : memref<1x64xf32, #tpu.memory_space<vmem>>, vector<1x64xf32>
    %c0_1 = arith.constant 0 : index
    %c0_2 = arith.constant 0 : index
    %1 = vector.load %arg2[%c0_1, %c0_2] : memref<128x8xf32, #tpu.memory_space<vmem>>, vector<128x8xf32>
    %2 = vector.extract_strided_slice %1 {offsets = [0, 0], sizes = [128, 1], strides = [1, 1]} : vector<128x8xf32> to vector<128x1xf32>
    %3 = vector.extract_strided_slice %1 {offsets = [0, 1], sizes = [128, 1], strides = [1, 1]} : vector<128x8xf32> to vector<128x1xf32>
    %4 = vector.extract_strided_slice %1 {offsets = [0, 2], sizes = [128, 1], strides = [1, 1]} : vector<128x8xf32> to vector<128x1xf32>
    %5 = vector.extract_strided_slice %1 {offsets = [0, 3], sizes = [128, 1], strides = [1, 1]} : vector<128x8xf32> to vector<128x1xf32>
    %6 = vector.extract_strided_slice %1 {offsets = [0, 4], sizes = [8, 1], strides = [1, 1]} : vector<128x8xf32> to vector<8x1xf32>
    %7 = vector.extract_strided_slice %1 {offsets = [0, 5], sizes = [1, 1], strides = [1, 1]} : vector<128x8xf32> to vector<1x1xf32>
    %8 = vector.broadcast %2 : vector<128x1xf32> to vector<128x64xf32>
    %9 = vector.broadcast %0 : vector<1x64xf32> to vector<128x64xf32>
    %10 = arith.mulf %8, %9 : vector<128x64xf32>
    %11 = vector.broadcast %3 : vector<128x1xf32> to vector<128x64xf32>
    %12 = arith.addf %10, %11 : vector<128x64xf32>
    %cst = arith.constant 0.000000e+00 : f32
    %13 = vector.broadcast %cst : f32 to vector<128x64xf32>
    %14 = arith.maximumf %12, %13 : vector<128x64xf32>
    %c0_3 = arith.constant 0 : index
    %c0_4 = arith.constant 0 : index
    %c0_5 = arith.constant 0 : index
    %15 = vector.load %arg3[%c0_3, %c0_4, %c0_5] : memref<2x128x128xbf16, #tpu.memory_space<vmem>>, vector<1x128x128xbf16>
    %16 = vector.shape_cast %15 : vector<1x128x128xbf16> to vector<128x128xbf16>
    %17 = arith.truncf %14 : vector<128x64xf32> to vector<128x64xbf16>
    %cst_6 = arith.constant dense<0.000000e+00> : vector<128x64xf32>
    %18 = tpu.matmul %16, %17, %cst_6 {dimension_numbers = #tpu.dot_dimension_numbers<[1], [0], [0], [1], [0, 0, 1, 1], [], []>} : vector<128x128xbf16>, vector<128x64xbf16>, vector<128x64xf32> -> vector<128x64xf32>
    %19 = vector.broadcast %4 : vector<128x1xf32> to vector<128x64xf32>
    %20 = arith.addf %18, %19 : vector<128x64xf32>
    %cst_7 = arith.constant 0.000000e+00 : f32
    %21 = vector.broadcast %cst_7 : f32 to vector<128x64xf32>
    %22 = arith.maximumf %20, %21 : vector<128x64xf32>
    %c1 = arith.constant 1 : index
    %c0_8 = arith.constant 0 : index
    %c0_9 = arith.constant 0 : index
    %23 = vector.load %arg3[%c1, %c0_8, %c0_9] : memref<2x128x128xbf16, #tpu.memory_space<vmem>>, vector<1x128x128xbf16>
    %24 = vector.shape_cast %23 : vector<1x128x128xbf16> to vector<128x128xbf16>
    %25 = arith.truncf %22 : vector<128x64xf32> to vector<128x64xbf16>
    %cst_10 = arith.constant dense<0.000000e+00> : vector<128x64xf32>
    %26 = tpu.matmul %24, %25, %cst_10 {dimension_numbers = #tpu.dot_dimension_numbers<[1], [0], [0], [1], [0, 0, 1, 1], [], []>} : vector<128x128xbf16>, vector<128x64xbf16>, vector<128x64xf32> -> vector<128x64xf32>
    %27 = vector.broadcast %5 : vector<128x1xf32> to vector<128x64xf32>
    %28 = arith.addf %26, %27 : vector<128x64xf32>
    %cst_11 = arith.constant 0.000000e+00 : f32
    %29 = vector.broadcast %cst_11 : f32 to vector<128x64xf32>
    %30 = arith.maximumf %28, %29 : vector<128x64xf32>
    %31 = vector.extract_strided_slice %30 {offsets = [0, 0], sizes = [8, 64], strides = [1, 1]} : vector<128x64xf32> to vector<8x64xf32>
    %32 = vector.broadcast %6 : vector<8x1xf32> to vector<8x64xf32>
    %33 = arith.mulf %31, %32 : vector<8x64xf32>
    %cst_12 = arith.constant dense<0.000000e+00> : vector<64xf32>
    %34 = vector.multi_reduction <add>, %33, %cst_12 [0] : vector<8x64xf32> to vector<64xf32>
    %35 = vector.shape_cast %34 : vector<64xf32> to vector<1x64xf32>
    %36 = vector.broadcast %7 : vector<1x1xf32> to vector<1x64xf32>
    %37 = arith.addf %35, %36 : vector<1x64xf32>
    %c0_13 = arith.constant 0 : index
    %c0_14 = arith.constant 0 : index
    %38 = vector.load %arg4[%c0_13, %c0_14] : memref<1x64xf32, #tpu.memory_space<vmem>>, vector<1x64xf32>
    tpu.vector_store %arg4[%c0_13, %c0_14], %37 {strides = array<i32>} : memref<1x64xf32, #tpu.memory_space<vmem>>, vector<1x64xf32>,
    return
  }
  func.func @transform_0(%arg0: i32) -> (i32, i32) {
    %c0_i32 = arith.constant 0 : i32
    %c0_i32_0 = arith.constant 0 : i32
    return %c0_i32, %arg0 : i32, i32
  }
  func.func @transform_1(%arg0: i32) -> (i32, i32) {
    %c0_i32 = arith.constant 0 : i32
    %c0_i32_0 = arith.constant 0 : i32
    %c0_i32_1 = arith.constant 0 : i32
    return %c0_i32, %c0_i32_0 : i32, i32
  }
  func.func @transform_2(%arg0: i32) -> (i32, i32, i32) {
    %c0_i32 = arith.constant 0 : i32
    %c0_i32_0 = arith.constant 0 : i32
    %c0_i32_1 = arith.constant 0 : i32
    %c0_i32_2 = arith.constant 0 : i32
    return %c0_i32, %c0_i32_0, %c0_i32_1 : i32, i32, i32
  }
  func.func @transform_3(%arg0: i32) -> (i32, i32) {
    %c0_i32 = arith.constant 0 : i32
    %c0_i32_0 = arith.constant 0 : i32
    return %c0_i32, %arg0 : i32, i32
  }
}

</mosaic_0001>

<bundles_post_ra>
// kernel: model_quad_2_forward.1
= control target key start
LH: loop header
LB: loop body
LE: loop exit
PB: predicated region body
PF: predicated region fallthrough
CT: control target
= control target key end

     0   :  { %v919_v2 = vmov 1   ;;  %v920_v7 = vmov 0   ;;  %s1126_s0 = inlined_call_operand.vmem [shape: f32[1,64], index: 0, kind: input, shape index: {}]   ;;  %s1127_s1 = inlined_call_operand.vmem [shape: f32[128,8], index: 1, kind: input, shape index: {}]   ;;  %s1128_s2 = inlined_call_operand.vmem [shape: bf16[2,128,128], index: 2, kind: input, shape index: {}]   ;;  %s1129_s3 = inlined_call_operand.hbm [shape: f32[1,64], index: 3, kind: output, shape index: {}]  }
   0x1   :  { %v949_v0 = vld [vmem:[%s1127_s1 + $0x10] sm:$0xff]  ;;  %v954_v1 = vld [vmem:[%s1127_s1] sm:$0xff]  ;;  %857 = vset.pattern.permute.xlu0 %v919_v2  ;;  %855 = vset.pattern.permute.xlu1 %v919_v2  ;;  %v968_v4 = vld [vmem:[%s1127_s1 + $0x8] sm:$0xff] }
   0x2   :  { %144 = vperm.xlu0 %857, %v949_v0   ;;  %136 = vperm.xlu1 %855, %v954_v1   ;;  %v963_v3 = vld [vmem:[%s1127_s1 + $0x30] sm:$0xff]  ;;  %v980_v6 = vld [vmem:[%s1127_s1 + $0x18] sm:$0xff] }
   0x3   :  { %v973_v5 = vld [vmem:[%s1127_s1 + $0x50] sm:$0xff] }
   0x6   :  { %160 = vperm.xlu0 %857, %v963_v3   ;;  %140 = vperm.xlu1 %855, %v968_v4  }
   0xa   :  { %176 = vperm.xlu0 %857, %v973_v5   ;;  %856 = vset.pattern.permute.xlu1 %v920_v7 }
   0xb   :  { %50 = vperm.xlu1 %856, %v980_v6  }
   0xe   :  { %866 = vset.pattern.permute.xlu0 %v920_v7 }
   0xf   :  { %35 = vperm.xlu0 %866, %v954_v1   ;;  %858 = vset.pattern.permute.xlu1 %v919_v2 }
  0x10   :  { %148 = vperm.xlu1 %858, %v980_v6  }
  0x11   :  { %8 = vsyncpa [#allocation3], 0  ;;  %v21_v8 = vld [vmem:[%s1127_s1 + $0x20] sm:$0xff]  ;;  %v22_v9 = vld [vmem:[%s1127_s1 + $0x28] sm:$0xff]  ;;  %v921_v19 = vmov 2   ;;  %vm690_vm0 = vcmask 523264  }
  0x12   :  { %v26_v10 = vld [vmem:[%s1127_s1 + $0x48] sm:$0xff]  ;;  %v24_v11 = vld [vmem:[%s1127_s1 + $0x38] sm:$0xff]  ;;  %v25_v13 = vld [vmem:[%s1127_s1 + $0x40] sm:$0xff]  ;;  %vm703_vm1 = vcmask 516096  }
  0x13   :  { %40 = vperm.xlu0 %866, %v968_v4   ;;  %v1008_v12 = vld [vmem:[%s1127_s1 + $0x68] sm:$0xff]  ;;  %v31_v14 = vld [vmem:[%s1127_s1 + $0x70] sm:$0xff]  ;;  %v28_v15 = vld [vmem:[%s1127_s1 + $0x58] sm:$0xff] }
  0x14   :  { %859 = vset.pattern.permute.xlu1 %v920_v7  ;;  %v29_v16 = vld [vmem:[%s1127_s1 + $0x60] sm:$0xff]  ;;  %v32_v17 = vld [vmem:[%s1127_s1 + $0x78] sm:$0xff] }
  0x15   :  { %55 = vperm.xlu1 %859, %v21_v8   ;;  %v879_v18 = vld [vmem:[%s1128_s2] sm:$0xff]  }
  0x16   :  { %800 = vmatprep.mubr.bf16.mxu0 %v879_v18  ;;  %v1046_v26 = vld [vmem:[%s1126_s0] ss:$0 sm:$0xff] }
  0x17   :  { %45 = vperm.xlu0 %866, %v949_v0  }
  0x19   :  { %860 = vset.pattern.permute.xlu1 %v919_v2 }
  0x1a   :  { %152 = vperm.xlu1 %860, %v21_v8  }
  0x1b   :  { %60 = vperm.xlu0 %866, %v22_v9  }
  0x1e   :  { %156 = vperm.xlu1 %860, %v22_v9  }
  0x1f   :  { %65 = vperm.xlu0 %866, %v963_v3  }
  0x22   :  { %861 = vset.pattern.permute.xlu1 %v920_v7 }
  0x23   :  { %80 = vperm.xlu0 %866, %v26_v10   ;;  %70 = vperm.xlu1 %861, %v24_v11  }
  0x27   :  { %85 = vperm.xlu0 %866, %v973_v5   ;;  %862 = vset.pattern.permute.xlu1 %v919_v2 }
  0x28   :  { %164 = vperm.xlu1 %862, %v24_v11  }
  0x2b   :  { %100 = vperm.xlu0 %866, %v1008_v12  }
  0x2c   :  { %863 = vset.pattern.permute.xlu1 %v920_v7 }
  0x2d   :  { %75 = vperm.xlu1 %863, %v25_v13  }
  0x2f   :  { %105 = vperm.xlu0 %866, %v31_v14  }
  0x31   :  { %864 = vset.pattern.permute.xlu1 %v919_v2 }
  0x32   :  { %168 = vperm.xlu1 %864, %v25_v13  }
  0x33   :  { %871 = vset.pattern.permute.xlu0 %v919_v2 }
  0x34   :  { %192 = vperm.xlu0 %871, %v31_v14  }
  0x36   :  { %172 = vperm.xlu1 %864, %v26_v10  }
  0x38   :  { %874 = vset.pattern.permute.xlu0 %v921_v19 }
  0x39   :  { %260 = vperm.xlu0 %874, %v968_v4  }
  0x3a   :  { %865 = vset.pattern.permute.xlu1 %v920_v7 }
  0x3b   :  { %90 = vperm.xlu1 %865, %v28_v15  }
  0x3d   :  { %272 = vperm.xlu0 %874, %v21_v8  }
  0x3f   :  { %867 = vset.pattern.permute.xlu1 %v919_v2 }
  0x40   :  { %180 = vperm.xlu1 %867, %v28_v15  }
  0x41   :  { %280 = vperm.xlu0 %874, %v963_v3  }
  0x44   :  { %868 = vset.pattern.permute.xlu1 %v920_v7 }
  0x45   :  { %95 = vperm.xlu1 %868, %v29_v16   ;;  %288 = vperm.xlu0 %874, %v25_v13  }
  0x49   :  { %869 = vset.pattern.permute.xlu1 %v919_v2  ;;  %296 = vperm.xlu0 %874, %v973_v5  }
  0x4a   :  { %184 = vperm.xlu1 %869, %v29_v16  }
  0x4d   :  { %304 = vperm.xlu0 %874, %v29_v16  }
  0x4e   :  { %188 = vperm.xlu1 %869, %v1008_v12  }
  0x51   :  { %312 = vperm.xlu0 %874, %v31_v14  }
  0x52   :  { %870 = vset.pattern.permute.xlu1 %v920_v7 }
  0x53   :  { %110 = vperm.xlu1 %870, %v32_v17  }
  0x57   :  { %872 = vset.pattern.permute.xlu1 %v919_v2 }
  0x58   :  { %196 = vperm.xlu1 %872, %v32_v17  }
  0x5c   :  { %873 = vset.pattern.permute.xlu1 %v921_v19 }
  0x5d   :  { %256 = vperm.xlu1 %873, %v954_v1  }
  0x61   :  { %264 = vperm.xlu1 %873, %v949_v0  }
  0x65   :  { %268 = vperm.xlu1 %873, %v980_v6  }
  0x69   :  { %276 = vperm.xlu1 %873, %v22_v9  }
  0x6d   :  { %284 = vperm.xlu1 %873, %v24_v11  }
  0x71   :  { %292 = vperm.xlu1 %873, %v26_v10  }
  0x75   :  { %300 = vperm.xlu1 %873, %v28_v15  }
  0x79   :  { %308 = vperm.xlu1 %873, %v1008_v12  }
  0x7d   :  { %316 = vperm.xlu1 %873, %v32_v17  }
  0x81   :  { %v137_v20 = vpop.permute.xlu1 %136  ;;  %v145_v21 = vpop.permute.xlu0 %144 }
  0x85   :  { %v141_v22 = vpop.permute.xlu1 %140  ;;  %v161_v23 = vpop.permute.xlu0 %160 }
  0x89   :  { %v1040_v24 = vpop.permute.xlu0 %176 }
  0x8a   :  { %v51_v25 = vpop.permute.xlu1 %50 }
  0x8b   :  { %v122_v34 = vmul.f32 %v1046_v26, %v51_v25 }
  0x8e   :  { %v36_v27 = vpop.permute.xlu0 %35 }
  0x8f   :  { %v119_v28 = vmul.f32 %v1046_v26, %v36_v27  ;;  %v149_v29 = vpop.permute.xlu1 %148 }
  0x90   :  { %v202_v38 = vadd.f32 %v149_v29, %v122_v34 }
  0x91   :  { %v199_v31 = vadd.f32 %v137_v20, %v119_v28 }
  0x92   :  { %v41_v30 = vpop.permute.xlu0 %40  ;;  %v218_v46 = vmax.f32 %v202_v38, 0.0 }
  0x93   :  { %v120_v32 = vmul.f32 %v1046_v26, %v41_v30  ;;  %v215_v37 = vmax.f32 %v199_v31, 0.0 }
  0x94   :  { %v56_v33 = vpop.permute.xlu1 %55 }
  0x95   :  { %v200_v35 = vadd.f32 %v141_v22, %v120_v32  ;;  %v123_v44 = vmul.f32 %v1046_v26, %v56_v33 }
  0x96   :  { %v46_v36 = vpop.permute.xlu0 %45 }
  0x97   :  { %v216_v39 = vmax.f32 %v200_v35, 0.0  ;;  %v121_v40 = vmul.f32 %v1046_v26, %v46_v36 }
  0x99   :  { %v201_v41 = vadd.f32 %v145_v21, %v121_v40  ;;  %v153_v42 = vpop.permute.xlu1 %152  ;;  %v247_v43 = vpack.c.bf16 %v216_v39, %v215_v37 }
  0x9a   :  { %v61_v45 = vpop.permute.xlu0 %60  ;;  %v203_v49 = vadd.f32 %v153_v42, %v123_v44 }
  0x9b   :  { %v217_v47 = vmax.f32 %v201_v41, 0.0  ;;  %v124_v48 = vmul.f32 %v1046_v26, %v61_v45  ;;  %784 = vmatprep.subr.bf16.mxu0 %v247_v43 }
  0x9c   :  { %785 = vmatpush3.bf16.msra.mxu0 %v247_v43  ;;  %v219_v53 = vmax.f32 %v203_v49, 0.0  ;;  %v883_v49 = vld [vmem:[%s1128_s2 + $0x20] sm:$0xff]  }
  0x9d   :  { %v157_v50 = vpop.permute.xlu1 %156  ;;  %v248_v51 = vpack.c.bf16 %v218_v46, %v217_v47  ;;  %v880_v47 = vld [vmem:[%s1128_s2 + $0x8] sm:$0xff]  }
  0x9e   :  { %v204_v52 = vadd.f32 %v157_v50, %v124_v48  ;;  %v66_v55 = vpop.permute.xlu0 %65  ;;  %v881_v48 = vld [vmem:[%s1128_s2 + $0x10] sm:$0xff]   ;;  %v884_v50 = vld [vmem:[%s1128_s2 + $0x28] sm:$0xff]  }
  0x9f   :  { %786 = vmatprep.subr.bf16.mxu0 %v248_v51  ;;  %v125_v57 = vmul.f32 %v1046_v26, %v66_v55  ;;  %v923_v55 = vmov 4  }
  0xa0   :  { %v220_v54 = vmax.f32 %v204_v52, 0.0  ;;  %787 = vmatpush3.bf16.msra.mxu0 %v248_v51  ;;  %v885_v51 = vld [vmem:[%s1128_s2 + $0x30] sm:$0xff]   ;;  %v886_v52 = vld [vmem:[%s1128_s2 + $0x38] sm:$0xff]   ;;  %876 = vset.pattern.permute.xlu1 %v923_v55 }
  0xa1   :  { %v205_v59 = vadd.f32 %v161_v23, %v125_v57  ;;  %686 = vperm.xlu1 %876, %v954_v1  }
  0xa2   :  { %v249_v56 = vpack.c.bf16 %v220_v54, %v219_v53  ;;  %v71_v58 = vpop.permute.xlu1 %70  ;;  %v81_v4 = vpop.permute.xlu0 %80  ;;  %v887_v53 = vld [vmem:[%s1128_s2 + $0x40] sm:$0xff]   ;;  %v922_v54 = vmov 3  }
  0xa3   :  { %v126_v60 = vmul.f32 %v1046_v26, %v71_v58  ;;  %v221_v63 = vmax.f32 %v205_v59, 0.0  ;;  %v128_v6 = vmul.f32 %v1046_v26, %v81_v4  ;;  %832 = vmatprep.mubr.bf16.mxu1 %v887_v53  ;;  %875 = vset.pattern.permute.xlu0 %v922_v54 }
  0xa4   :  { %788 = vmatprep.subr.bf16.mxu0 %v249_v56  ;;  %506 = vperm.xlu0 %875, %v954_v1  }
  0xa5   :  { %789 = vmatpush3.bf16.msra.mxu0 %v249_v56  ;;  %v924_v56 = vmov 5  }
  0xa6   :  { %v86_v11 = vpop.permute.xlu0 %85  ;;  %877 = vset.pattern.permute.xlu1 %v924_v56 }
  0xa7   :  { %v165_v61 = vpop.permute.xlu1 %164  ;;  %v129_v14 = vmul.f32 %v1046_v26, %v86_v11  ;;  %699 = vperm.xlu1 %877, %v954_v1  }
  0xa8   :  { %v206_v62 = vadd.f32 %v165_v61, %v126_v60  ;;  %878 = vset.pattern.permute.xlu0 %v924_v56 }
  0xa9   :  { %v209_v17 = vadd.f32 %v1040_v24, %v129_v14 }
  0xaa   :  { %v222_v0 = vmax.f32 %v206_v62, 0.0  ;;  %v101_v27 = vpop.permute.xlu0 %100 }
  0xab   :  { %v225_v21 = vmax.f32 %v209_v17, 0.0  ;;  %v132_v30 = vmul.f32 %v1046_v26, %v101_v27 }
  0xac   :  { %v250_v2 = vpack.c.bf16 %v222_v0, %v221_v63  ;;  %v76_v3 = vpop.permute.xlu1 %75 }
  0xad   :  { %v127_v7 = vmul.f32 %v1046_v26, %v76_v3 }
  0xae   :  { %790 = vmatprep.subr.bf16.mxu0 %v250_v2  ;;  %v106_v32 = vpop.permute.xlu0 %105 }
  0xaf   :  { %791 = vmatpush3.bf16.msra.mxu0 %v250_v2  ;;  %v133_v36 = vmul.f32 %v1046_v26, %v106_v32 }
  0xb1   :  { %v169_v5 = vpop.permute.xlu1 %168 }
  0xb2   :  { %v207_v8 = vadd.f32 %v169_v5, %v127_v7 }
  0xb3   :  { %v193_v39 = vpop.permute.xlu0 %192 }
  0xb4   :  { %v223_v12 = vmax.f32 %v207_v8, 0.0  ;;  %v213_v40 = vadd.f32 %v193_v39, %v133_v36 }
  0xb5   :  { %v173_v9 = vpop.permute.xlu1 %172 }
  0xb6   :  { %v208_v10 = vadd.f32 %v173_v9, %v128_v6  ;;  %v229_v44 = vmax.f32 %v213_v40, 0.0 }
  0xb8   :  { %v224_v13 = vmax.f32 %v208_v10, 0.0  ;;  %v261_v59 = vpop.permute.xlu0 %260 }
  0xba   :  { %v251_v15 = vpack.c.bf16 %v224_v13, %v223_v12  ;;  %v91_v16 = vpop.permute.xlu1 %90 }
  0xbb   :  { %v130_v18 = vmul.f32 %v1046_v26, %v91_v16 }
  0xbc   :  { %792 = vmatprep.subr.bf16.mxu0 %v251_v15  ;;  %v273_v61 = vpop.permute.xlu0 %272 }
  0xbd   :  { %793 = vmatpush3.bf16.msra.mxu0 %v251_v15 }
  0xbf   :  { %v181_v19 = vpop.permute.xlu1 %180 }
  0xc0   :  { %v210_v20 = vadd.f32 %v181_v19, %v130_v18  ;;  %v281_v63 = vpop.permute.xlu0 %280 }
  0xc2   :  { %v226_v22 = vmax.f32 %v210_v20, 0.0 }
  0xc4   :  { %v252_v23 = vpack.c.bf16 %v226_v22, %v225_v21  ;;  %v96_v25 = vpop.permute.xlu1 %95  ;;  %v289_v12 = vpop.permute.xlu0 %288 }
  0xc5   :  { %v131_v29 = vmul.f32 %v1046_v26, %v96_v25 }
  0xc6   :  { %794 = vmatprep.subr.bf16.mxu0 %v252_v23 }
  0xc7   :  { %795 = vmatpush3.bf16.msra.mxu0 %v252_v23 }
  0xc8   :  { %v297_v25 = vpop.permute.xlu0 %296 }
  0xc9   :  { %v185_v28 = vpop.permute.xlu1 %184 }
  0xca   :  { %v211_v31 = vadd.f32 %v185_v28, %v131_v29 }
  0xcc   :  { %v227_v34 = vmax.f32 %v211_v31, 0.0 }
  0xcd   :  { %v189_v33 = vpop.permute.xlu1 %188 }
  0xce   :  { %v212_v24 = vadd.f32 %v189_v33, %v132_v30 }
  0xd0   :  { %v228_v35 = vmax.f32 %v212_v24, 0.0 }
  0xd2   :  { %v253_v37 = vpack.c.bf16 %v228_v35, %v227_v34  ;;  %v111_v38 = vpop.permute.xlu1 %110 }
  0xd3   :  { %v134_v41 = vmul.f32 %v1046_v26, %v111_v38  ;;  %v882_v26 = vld [vmem:[%s1128_s2 + $0x18] sm:$0xff]  }
  0xd4   :  { %796 = vmatprep.subr.bf16.mxu0 %v253_v37 }
  0xd5   :  { %797 = vmatpush3.bf16.msra.mxu0 %v253_v37  ;;  %v305_v37 = vpop.permute.xlu0 %304 }
  0xd7   :  { %v197_v42 = vpop.permute.xlu1 %196 }
  0xd8   :  { %v214_v43 = vadd.f32 %v197_v42, %v134_v41 }
  0xda   :  { %v230_v45 = vmax.f32 %v214_v43, 0.0 }
  0xdc   :  { %v254_v46 = vpack.c.bf16 %v230_v45, %v229_v44  ;;  %v257_v57 = vpop.permute.xlu1 %256 }
  0xde   :  { %798 = vmatprep.subr.bf16.mxu0 %v254_v46 }
  0xdf   :  { %799 = vmatpush3.bf16.msra.mxu0 %v254_v46 }
  0xe0   :  { %v265_v58 = vpop.permute.xlu1 %264 }
  0xe2   :  { %801 = vmatmul.mubr.bf16.vlgmr.msra.gmra.mrb[0].mxu0 %v880_v47 }
  0xe3   :  { %804 = vmatprep.mubr.bf16.mxu0 %v881_v48 }
  0xe4   :  { %v269_v60 = vpop.permute.xlu1 %268 }
  0xe8   :  { %v277_v62 = vpop.permute.xlu1 %276 }
  0xea   :  { %805 = vmatmul.mubr.bf16.gmra.mrb[4].mxu0 %v882_v26  ;;  %v313_v26 = vpop.permute.xlu0 %312 }
  0xeb   :  { %808 = vmatprep.mubr.bf16.mxu0 %v883_v49 }
  0xec   :  { %v285_v4 = vpop.permute.xlu1 %284 }
  0xf0   :  { %v293_v15 = vpop.permute.xlu1 %292 }
  0xf2   :  { %809 = vmatmul.mubr.bf16.gmra.mrb[8].mxu0 %v884_v50 }
  0xf3   :  { %812 = vmatprep.mubr.bf16.mxu0 %v885_v51 }
  0xf4   :  { %v301_v30 = vpop.permute.xlu1 %300 }
  0xf8   :  { %v309_v42 = vpop.permute.xlu1 %308 }
  0xfa   :  { %813 = vmatmul.mubr.bf16.gmra.mrb[12].mxu0 %v886_v52 }
  0xfc   :  { %v317_v53 = vpop.permute.xlu1 %316 }
 0x1b5   :  { %v802_v0 = vpop.f32.mrb[0].mxu0 }
 0x1b6   :  { %v410_v2 = vadd.f32 %v802_v0, %v265_v58  ;;  %v401_v3 = vpop.f32.mrb[1].mxu0 }
 0x1b7   :  { %v402_v5 = vadd.f32 %v401_v3, %v257_v57  ;;  %v803_v6 = vpop.f32.mrb[2].mxu0  ;;  %v889_v3 = vld [vmem:[%s1128_s2 + $0x50] sm:$0xff]  }
 0x1b8   :  { %v413_v7 = vadd.f32 %v803_v6, %v269_v60  ;;  %v404_v8 = vpop.f32.mrb[3].mxu0  ;;  %v466_v10 = vmax.f32 %v410_v2, 0.0  ;;  %v888_v2 = vld [vmem:[%s1128_s2 + $0x48] sm:$0xff]  }
 0x1b9   :  { %v405_v9 = vadd.f32 %v404_v8, %v261_v59  ;;  %v464_v1 = vmax.f32 %v402_v5, 0.0  ;;  %v891_v5 = vld [vmem:[%s1128_s2 + $0x60] sm:$0xff]   ;;  %v892_v6 = vld [vmem:[%s1128_s2 + $0x68] sm:$0xff]   ;;  %v894_v8 = vld [vmem:[%s1128_s2 + $0x78] sm:$0xff]  }
 0x1ba   :  { %v467_v11 = vmax.f32 %v413_v7, 0.0  ;;  %v893_v7 = vld [vmem:[%s1128_s2 + $0x70] sm:$0xff]  }
 0x1bb   :  { %v465_v13 = vmax.f32 %v405_v9, 0.0  ;;  %v507_v9 = vpop.permute.xlu0 %506 }
 0x1bc   :  { %v498_v14 = vpack.c.bf16 %v467_v11, %v466_v10 }
 0x1bd   :  { %v806_v16 = vpop.f32.mrb[4].mxu0  ;;  %v497_v17 = vpack.c.bf16 %v465_v13, %v464_v1 }
 0x1be   :  { %v426_v18 = vadd.f32 %v806_v16, %v281_v63  ;;  %v417_v19 = vpop.f32.mrb[5].mxu0 }
 0x1bf   :  { %v418_v20 = vadd.f32 %v417_v19, %v273_v61  ;;  %v807_v21 = vpop.f32.mrb[6].mxu0  ;;  %816 = vmatprep.subr.bf16.mxu1 %v497_v17 }
 0x1c0   :  { %v429_v22 = vadd.f32 %v807_v21, %v285_v4  ;;  %v420_v23 = vpop.f32.mrb[7].mxu0  ;;  %817 = vmatpush3.bf16.msra.mxu1 %v497_v17  ;;  %v470_v28 = vmax.f32 %v426_v18, 0.0  ;;  %v890_v4 = vld [vmem:[%s1128_s2 + $0x58] sm:$0xff]   ;;  %s925_s2 = smov [#allocation2]  }
 0x1c1   :  { %v421_v27 = vadd.f32 %v420_v23, %v277_v62  ;;  %818 = vmatprep.subr.bf16.mxu1 %v498_v14  ;;  %v468_v31 = vmax.f32 %v418_v20, 0.0  ;;  %s711_s20 = sshll.u32 %s925_s2, 4  ;;  %s712_s20 = int_to_ptr.vmem [resolvable:$true] %s711_s20 }
 0x1c2   :  { %v471_v29 = vmax.f32 %v429_v22, 0.0  ;;  %s895_s21 = scalar_lea.vmem %s712_s20, 16  ;;  %s899_s22 = scalar_lea.vmem %s712_s20, 32 }
 0x1c3   :  { %v469_v32 = vmax.f32 %v421_v27, 0.0  ;;  %p896_p0 = scmp.ne.s32.totalorder %s712_s20, %s895_s21  ;;  %p900_p1 = scmp.lt.s32.totalorder %s712_s20, %s712_s20 }
 0x1c4   :  { %v500_v33 = vpack.c.bf16 %v471_v29, %v470_v28  ;;  %819 = vmatpush3.bf16.msra.mxu1 %v498_v14  ;;  %v687_v14 = vpop.permute.xlu1 %686  ;;  %p901_p2 = scmp.lt.s32.totalorder %s899_s22, %s895_s21 }
 0x1c5   :  { %v499_v24 = vpack.c.bf16 %v469_v32, %v468_v31  ;;  %v810_v34 = vpop.f32.mrb[8].mxu0 }
 0x1c6   :  { %v442_v35 = vadd.f32 %v810_v34, %v297_v25  ;;  %v433_v36 = vpop.f32.mrb[9].mxu0  ;;  %p902_p3 = por %p901_p2, %p900_p1 }
 0x1c7   :  { %v434_v38 = vadd.f32 %v433_v36, %v289_v12  ;;  %v811_v39 = vpop.f32.mrb[10].mxu0  ;;  %820 = vmatprep.subr.bf16.mxu1 %v499_v24 }
 0x1c8   :  { %v445_v40 = vadd.f32 %v811_v39, %v301_v30  ;;  %v436_v41 = vpop.f32.mrb[11].mxu0  ;;  %821 = vmatpush3.bf16.msra.mxu1 %v499_v24  ;;  %v474_v44 = vmax.f32 %v442_v35, 0.0  ;;  %v700_v32 = vpop.permute.xlu1 %699  ;;  %p903_p4 = pnand %p902_p3, %p896_p0 }
 0x1c9   :  { %v437_v43 = vadd.f32 %v436_v41, %v293_v15  ;;  %822 = vmatprep.subr.bf16.mxu1 %v500_v33  ;;  %v472_v46 = vmax.f32 %v434_v38, 0.0 }
 0x1ca   :  { %v475_v45 = vmax.f32 %v445_v40, 0.0 }
 0x1cb   :  { %v473_v47 = vmax.f32 %v437_v43, 0.0 }
 0x1cc   :  { %v502_v48 = vpack.c.bf16 %v475_v45, %v474_v44  ;;  %823 = vmatpush3.bf16.msra.mxu1 %v500_v33 }
 0x1cd   :  { %v501_v49 = vpack.c.bf16 %v473_v47, %v472_v46  ;;  %v814_v50 = vpop.f32.mrb[12].mxu0 }
 0x1ce   :  { %v458_v51 = vadd.f32 %v814_v50, %v313_v26  ;;  %v449_v52 = vpop.f32.mrb[13].mxu0 }
 0x1cf   :  { %v450_v54 = vadd.f32 %v449_v52, %v305_v37  ;;  %v815_v55 = vpop.f32.mrb[14].mxu0  ;;  %824 = vmatprep.subr.bf16.mxu1 %v501_v49 }
 0x1d0   :  { %v461_v56 = vadd.f32 %v815_v55, %v317_v53  ;;  %v452_v57 = vpop.f32.mrb[15].mxu0  ;;  %825 = vmatpush3.bf16.msra.mxu1 %v501_v49  ;;  %v478_v59 = vmax.f32 %v458_v51, 0.0 }
 0x1d1   :  { %v453_v58 = vadd.f32 %v452_v57, %v309_v42  ;;  %826 = vmatprep.subr.bf16.mxu1 %v502_v48  ;;  %v476_v61 = vmax.f32 %v450_v54, 0.0 }
 0x1d2   :  { %v479_v60 = vmax.f32 %v461_v56, 0.0 }
 0x1d3   :  { %v477_v62 = vmax.f32 %v453_v58, 0.0 }
 0x1d4   :  { %v504_v63 = vpack.c.bf16 %v479_v60, %v478_v59  ;;  %827 = vmatpush3.bf16.msra.mxu1 %v502_v48 }
 0x1d5   :  { %v503_v0 = vpack.c.bf16 %v477_v62, %v476_v61 }
 0x1d7   :  { %828 = vmatprep.subr.bf16.mxu1 %v503_v0 }
 0x1d8   :  { %829 = vmatpush3.bf16.msra.mxu1 %v503_v0 }
 0x1d9   :  { %830 = vmatprep.subr.bf16.mxu1 %v504_v63 }
 0x1dc   :  { %831 = vmatpush3.bf16.msra.mxu1 %v504_v63 }
 0x1df   :  { %833 = vmatmul.mubr.bf16.vlgmr.msra.gmra.mrb[0].mxu1 %v888_v2 }
 0x1e0   :  { %836 = vmatprep.mubr.bf16.mxu1 %v889_v3 }
 0x1e7   :  { %837 = vmatmul.mubr.bf16.gmra.mrb[4].mxu1 %v890_v4 }
 0x1e8   :  { %840 = vmatprep.mubr.bf16.mxu1 %v891_v5 }
 0x1ef   :  { %841 = vmatmul.mubr.bf16.gmra.mrb[8].mxu1 %v892_v6 }
 0x1f0   :  { %844 = vmatprep.mubr.bf16.mxu1 %v893_v7 }
 0x1f7   :  { %845 = vmatmul.mubr.bf16.gmra.mrb[12].mxu1 %v894_v8 }
 0x2b2   :  { %v834_v10 = vpop.f32.mrb[0].mxu1 }
 0x2b3   :  { %v636_v11 = vpop.f32.mrb[1].mxu1 }
 0x2b4   :  { %v637_v12 = vadd.f32 %v636_v11, %v507_v9  ;;  %v835_v1 = vpop.f32.mrb[2].mxu1 }
 0x2b5   :  { %v639_v13 = vpop.f32.mrb[3].mxu1 }
 0x2b6   :  { %v684_v15 = vmax.f32 %v637_v12, 0.0 }
 0x2b8   :  { %v689_v16 = vmul.f32 %v687_v14, %v684_v15 }
 0x2ba   :  { %v691_v17 = vsel %vm690_vm0, %v689_v16, 0.0  ;;  %v838_v18 = vpop.f32.mrb[4].mxu1 }
 0x2bb   :  { %v692_v19 = vrot.slane %v691_v17, 4  ;;  %v649_v20 = vpop.f32.mrb[5].mxu1 }
 0x2bc   :  { %v839_v21 = vpop.f32.mrb[6].mxu1 }
 0x2bd   :  { %v693_v22 = vadd.f32 %v692_v19, %v691_v17  ;;  %v651_v23 = vpop.f32.mrb[7].mxu1 }
 0x2bf   :  { %v694_v25 = vrot.slane %v693_v22, 2 }
 0x2c1   :  { %v695_v27 = vadd.f32 %v694_v25, %v693_v22 }
 0x2c2   :  { %v842_v28 = vpop.f32.mrb[8].mxu1 }
 0x2c3   :  { %v661_v29 = vpop.f32.mrb[9].mxu1  ;;  %v696_v30 = vrot.slane %v695_v27, 1 }
 0x2c4   :  { %v843_v31 = vpop.f32.mrb[10].mxu1 }
 0x2c5   :  { %v663_v33 = vpop.f32.mrb[11].mxu1  ;;  %v697_v24 = vadd.f32 %v696_v30, %v695_v27 }
 0x2c7   :  { %v702_v34 = vadd.f32 %v700_v32, %v697_v24 }
 0x2c9   :  { %704 = vst.msk [vmem:[#allocation2] sm:$0x1] %vm703_vm1, %v702_v34 }
 0x2ca   :  { %v846_v35 = vpop.f32.mrb[12].mxu1 }
 0x2cb   :  { %906 = shalt.err (!%p903_p4)
}
 0x2cc   :  { %s907_s25 = scalar_lea.hbm %s1129_s3, 16 }
 0x2cd   :  { %p908_p5 = scmp.ne.s32.totalorder %s1129_s3, %s907_s25  ;;  %p911_p6 = scmp.lt.u32.totalorder %s907_s25, %s1129_s3 }
 0x2cf   :  { %p913_p7 = pnand %p911_p6, %p908_p5 }
 0x2d1   :  { %916 = shalt.err (!%p913_p7)
}
 0x2d2   :  { %714 = dma.vmem_to_hbm [thread:$0]  %s712_s20, 16, %s1129_s3, [#allocation3]   ;;  %v673_v36 = vpop.f32.mrb[13].mxu1 }
 0x2d3   :  { %v847_v37 = vpop.f32.mrb[14].mxu1 }
 0x2d4   :  { %v675_v38 = vpop.f32.mrb[15].mxu1 }
 0x2d5   :  { %917 = dma.done.wait [#allocation3], 16  }
 0x2d6   :  { %918 = vsyncadd [#allocation3], 4294967280 }
 0x2d7   :  { %718 = vsyncpa [#allocation3], 1 }

</bundles_post_ra>
